<compile_context>
chip_gen: v5e
topology: v5e:2x2
jax: 0.10.0
libtpu: 0.0.40
codegen_flags: <defaults>
</compile_context>

<pallas_src>
import functools

import jax
import jax.numpy as jnp
from jax.experimental import pallas as pl
from jax.experimental.pallas import tpu as pltpu

_EPS = 1e-8  # same eps as torch.cosine_similarity


# ---------------------------------------------------------------------------
# Chip-aware configuration & tiling helpers
# ---------------------------------------------------------------------------
def _tpu_config():
    """Returns (num_tensorcores_per_device, vmem_byte_ceiling)."""
    kind = ""
    try:
        kind = jax.devices()[0].device_kind.lower()
    except Exception:
        pass
    if "v7" in kind or "7x" in kind:
        return 2, 48 * 1024 * 1024          # 2 TCs, 64 MiB physical VMEM -> leave headroom
    if "v6" in kind or "v5 lite" in kind or "v5e" in kind or "v5lite" in kind:
        return 1, 100 * 1024 * 1024         # 1 TC, 128 MiB physical VMEM
    if "v5" in kind or "v4" in kind:
        return 2, 100 * 1024 * 1024         # megacore chips (2 TCs), 128 MiB VMEM
    return 1, 32 * 1024 * 1024              # conservative default


def _round_up(x, m):
    return (x + m - 1) // m * m


def _choose_tm(nc, num_cores, vmem_cap):
    """Output-row tile: full nc on 1-core chips; >= num_cores blocks otherwise."""
    tm = nc
    if num_cores > 1 and nc % (8 * num_cores) == 0:
        tm = nc // num_cores
    # Keep the per-block (tm, nc) f32 working set well under the VMEM ceiling.
    while tm > 8 and tm % 16 == 0 and 3 * tm * nc * 4 > vmem_cap // 2:
        tm //= 2
    return tm


def _choose_tk(hw_pad, nc, itemsize, fixed_bytes, vmem_cap):
    """Largest contraction tile whose double-buffered (nc, tk) slab fits VMEM."""
    budget = int(0.85 * vmem_cap) - fixed_bytes
    cands = [hw_pad] + [t for t in (4096, 2048, 1024, 512, 256, 128)
                        if t < hw_pad and hw_pad % t == 0]
    for tk in cands:
        if 2 * nc * tk * itemsize <= budget:
            return tk
    return cands[-1]


def _flatten_features(x, compute_dtype=None):
    """(N, C, H, W) -> (nc, hw_pad) with hw zero-padded to a multiple of 128."""
    n, c, h, w = x.shape
    nc, hw = n * c, h * w
    feats = x.reshape(nc, hw)
    if compute_dtype is not None:
        feats = feats.astype(compute_dtype)
    hw_pad = _round_up(hw, 128)
    if hw_pad != hw:
        feats = jnp.pad(feats, ((0, 0), (0, hw_pad - hw)))
    return feats, nc, hw_pad


# ---------------------------------------------------------------------------
# Kernel 1: gram matrix  G = (F @ F.T) / (n*c*h*w)   (used once, for the target)
#   grid = (row_blocks "parallel", k_blocks "arbitrary").
#   Single input: the full-row (nc, tk) slab; the LHS row block is sliced from
#   it in-kernel.  Accumulation goes straight into the resident f32 output.
# ---------------------------------------------------------------------------
def _gram_kernel(f_ref, g_ref, *, tm, scale):
    i = pl.program_id(0)
    k = pl.program_id(1)

    @pl.when(k == 0)
    def _():
        g_ref[...] = jnp.zeros_like(g_ref)

    row0 = pl.multiple_of(i * tm, tm)
    lhs = f_ref[pl.ds(row0, tm), :]          # row block sliced from the resident slab
    g_ref[...] += jax.lax.dot_general(
        lhs, f_ref[...],
        dimension_numbers=(((1,), (1,)), ((), ())),
        preferred_element_type=jnp.float32,
    )

    @pl.when(k == pl.num_programs(1) - 1)
    def _():
        g_ref[...] = g_ref[...] * jnp.float32(scale)


def gram(x, *, compute_dtype=None):
    """x: (N, C, H, W) -> (N*C, N*C) gram matrix (float32)."""
    n, c, h, w = x.shape
    feats, nc, hw_pad = _flatten_features(x, compute_dtype)
    scale = 1.0 / float(n * c * h * w)
    isz = feats.dtype.itemsize

    num_cores, vmem_cap = _tpu_config()
    tm = _choose_tm(nc, num_cores, vmem_cap)
    fixed = 2 * tm * nc * 4                              # double-buffered output block
    tk = _choose_tk(hw_pad, nc, isz, fixed, vmem_cap)
    grid = (nc // tm, hw_pad // tk)

    est = fixed + 2 * nc * tk * isz
    vmem_limit = int(min(vmem_cap, max(int(1.5 * est), 32 * 1024 * 1024)))

    kern = functools.partial(_gram_kernel, tm=tm, scale=scale)
    return pl.pallas_call(
        kern,
        out_shape=jax.ShapeDtypeStruct((nc, nc), jnp.float32),
        grid=grid,
        in_specs=[pl.BlockSpec((nc, tk), lambda i, k: (0, k))],
        out_specs=pl.BlockSpec((tm, nc), lambda i, k: (i, 0)),
        compiler_params=pltpu.CompilerParams(
            dimension_semantics=("parallel", "arbitrary"),
            vmem_limit_bytes=vmem_limit,
        ),
    )(feats)


# ---------------------------------------------------------------------------
# Kernel 2 (hot path): fused gram + cosine row statistics.
#   Never writes G to HBM.  The pre-normalized target block Tn has index (i, 0)
#   for every k, so Pallas keeps it resident across the whole k loop (one DMA
#   per row block).
# ---------------------------------------------------------------------------
def _gram_cosine_kernel(f_ref, tn_ref, dp_ref, sq_ref, acc_ref, *, tm):
    i = pl.program_id(0)
    k = pl.program_id(1)

    @pl.when(k == 0)
    def _():
        acc_ref[...] = jnp.zeros_like(acc_ref)

    row0 = pl.multiple_of(i * tm, tm)
    lhs = f_ref[pl.ds(row0, tm), :]
    acc_ref[...] += jax.lax.dot_general(
        lhs, f_ref[...],
        dimension_numbers=(((1,), (1,)), ((), ())),
        preferred_element_type=jnp.float32,
    )

    @pl.when(k == pl.num_programs(1) - 1)
    def _():
        a = acc_ref[...]
        dp_ref[...] = jnp.sum(a * tn_ref[...], axis=1, keepdims=True)
        sq_ref[...] = jnp.sum(a * a, axis=1, keepdims=True)


def gram_cosine_rowstats(x, t_norm_rows, *, compute_dtype=None):
    """Per gram-row stats for the cosine loss:
         dp[r] = sum_col (F F^T)[r, :] * Tn[r, :]
         sq[r] = sum_col (F F^T)[r, :]^2
       Returns two (nc, 1) float32 arrays; G itself never touches HBM."""
    feats, nc, hw_pad = _flatten_features(x, compute_dtype)
    isz = feats.dtype.itemsize

    num_cores, vmem_cap = _tpu_config()
    tm = _choose_tm(nc, num_cores, vmem_cap)
    fixed = 3 * tm * nc * 4 + 4 * tm * 128 * 4           # Tn(x2) + acc + lane-padded outs
    tk = _choose_tk(hw_pad, nc, isz, fixed, vmem_cap)
    grid = (nc // tm, hw_pad // tk)

    est = fixed + 2 * nc * tk * isz
    vmem_limit = int(min(vmem_cap, max(int(1.5 * est), 32 * 1024 * 1024)))

    kern = functools.partial(_gram_cosine_kernel, tm=tm)
    return pl.pallas_call(
        kern,
        out_shape=(jax.ShapeDtypeStruct((nc, 1), jnp.float32),
                   jax.ShapeDtypeStruct((nc, 1), jnp.float32)),
        grid=grid,
        in_specs=[
            pl.BlockSpec((nc, tk), lambda i, k: (0, k)),   # feature slab (all rows)
            pl.BlockSpec((tm, nc), lambda i, k: (i, 0)),   # pre-normalized target rows
        ],
        out_specs=(pl.BlockSpec((tm, 1), lambda i, k: (i, 0)),
                   pl.BlockSpec((tm, 1), lambda i, k: (i, 0))),
        scratch_shapes=[pltpu.VMEM((tm, nc), jnp.float32)],
        compiler_params=pltpu.CompilerParams(
            dimension_semantics=("parallel", "arbitrary"),
            vmem_limit_bytes=vmem_limit,
        ),
    )(feats, t_norm_rows)


# ---------------------------------------------------------------------------
# StyleLoss module equivalent
# ---------------------------------------------------------------------------
def style_loss_value(x, t_norm_rows, *, compute_dtype=None):
    """Scalar style loss (jit-friendly). `t_norm_rows` is the target gram with
    the per-cosine-row inverse norm pre-folded (see StyleLoss.__init__)."""
    n, c, h, w = x.shape
    dp, sq = gram_cosine_rowstats(x, t_norm_rows, compute_dtype=compute_dtype)
    scale = jnp.float32(1.0 / (n * c * h * w))
    # Group the n*c gram rows into the c cosine rows of G.view(c, -1).
    dpg = jnp.sum(dp.reshape(c, n), axis=1)
    sqg = jnp.sum(sq.reshape(c, n), axis=1)
    g_norm = scale * jnp.sqrt(sqg)
    cos = (scale * dpg) / jnp.maximum(g_norm, jnp.float32(_EPS))
    return jnp.float32(1.0) - jnp.sum(cos) / jnp.float32(c)


class StyleLoss:
    """Pallas equivalent of the PyTorch StyleLoss module."""

    def __init__(self, target, *, compute_dtype=None):
        n, c, _, _ = target.shape
        self._compute_dtype = compute_dtype
        # Target gram (matches PyTorch's self.target numerically).
        tg = jax.lax.stop_gradient(gram(target, compute_dtype=compute_dtype))
        self.target = tg
        # Fold the per-cosine-row inverse target norm into the rows, once.
        t_view = tg.reshape(c, -1)
        t_norm = jnp.sqrt(jnp.sum(t_view * t_view, axis=1))           # (c,)
        inv_t = 1.0 / jnp.maximum(t_norm, jnp.float32(_EPS))          # (c,)
        inv_rows = jnp.repeat(inv_t, n)                               # (n*c,)
        self.t_norm_rows = (tg * inv_rows[:, None]).astype(jnp.float32)
        self.loss = None

    def __call__(self, x):
        # NOTE: stashing self.loss mirrors the PyTorch module but does not
        # compose with jax.jit (it would hold a tracer); use style_loss_value()
        # for a purely functional loss.
        self.loss = style_loss_value(x, self.t_norm_rows,
                                     compute_dtype=self._compute_dtype)
        return x


# Pure-JAX reference for sanity checking.
def _reference_loss(x, target):
    def _gram(a):
        n, c, h, w = a.shape
        f = a.reshape(n * c, h * w).astype(jnp.float32)
        return (f @ f.T) / (n * c * h * w)

    c = x.shape[1]
    G = _gram(x).reshape(c, -1)
    T = _gram(target).reshape(c, -1)
    eps = 1e-8
    dot = jnp.sum(G * T, axis=1)
    gn = jnp.maximum(jnp.linalg.norm(G, axis=1), eps)
    tn = jnp.maximum(jnp.linalg.norm(T, axis=1), eps)
    cos = dot / (gn * tn)
    return 1.0 - jnp.sum(cos) / c


if __name__ == "__main__":
    key = jax.random.PRNGKey(0)
    k_t, k_x = jax.random.split(key)
    # Small shapes consistent with an NCHW conv feature map.
    target = jax.random.normal(k_t, (2, 4, 16, 16), dtype=jnp.float32)
    x = jax.random.normal(k_x, (2, 4, 16, 16), dtype=jnp.float32)

    module = StyleLoss(target)
    out = module(x)
    out = jax.block_until_ready(out)
    loss = jax.block_until_ready(module.loss)

    ref = jax.block_until_ready(_reference_loss(x, target))
    assert jnp.allclose(loss, ref, rtol=1e-4, atol=1e-5), (loss, ref)
    assert out.shape == x.shape and out.dtype == x.dtype

    # The materialized target gram also matches the f32 reference gram.
    f_t = target.reshape(8, 256)
    tg_ref = (f_t @ f_t.T) / (2 * 4 * 16 * 16)
    assert jnp.allclose(module.target, tg_ref, rtol=1e-5, atol=1e-6)

    print("KERNEL_OK")
</pallas_src>

<mosaic_0001>
module attributes {stable_mosaic.version = 11 : i64} {
  func.func @_gram_kernel(%arg0: i32, %arg1: i32, %arg2: memref<8x256xf32, #tpu.memory_space<vmem>>, %arg3: memref<8x8xf32, #tpu.memory_space<vmem>>) attributes {dimension_semantics = [#tpu.dimension_semantics<parallel>, #tpu.dimension_semantics<arbitrary>], iteration_bounds = array<i64: 1, 1>, scalar_prefetch = 0 : i64, scratch_operands = 0 : i64, tpu.core_type = #tpu.core_type<tc>, window_params = [{transform_indices = @transform_0, window_bounds = array<i64: 8, 256>}, {transform_indices = @transform_1, window_bounds = array<i64: 8, 8>}]} {
    %c0_i32 = arith.constant 0 : i32
    %0 = arith.cmpi eq, %arg1, %c0_i32 : i32
    %1 = arith.extui %0 : i1 to i32
    %c0_i32_0 = arith.constant 0 : i32
    %2 = arith.cmpi ne, %1, %c0_i32_0 : i32
    scf.if %2 {
      %cst_9 = arith.constant 0.000000e+00 : f32
      %15 = vector.broadcast %cst_9 : f32 to vector<8x8xf32>
      %c0_10 = arith.constant 0 : index
      %c0_11 = arith.constant 0 : index
      %16 = vector.load %arg3[%c0_10, %c0_11] : memref<8x8xf32, #tpu.memory_space<vmem>>, vector<8x8xf32>
      tpu.vector_store %arg3[%c0_10, %c0_11], %15 {strides = array<i32>} : memref<8x8xf32, #tpu.memory_space<vmem>>, vector<8x8xf32>,
    } else {
    }
    %c8_i32 = arith.constant 8 : i32
    %3 = arith.muli %arg0, %c8_i32 : i32
    %4 = tpu.assume_multiple %3, 8 : i32
    %5 = arith.index_cast %4 : i32 to index
    %c0 = arith.constant 0 : index
    %6 = vector.load %arg2[%5, %c0] : memref<8x256xf32, #tpu.memory_space<vmem>>, vector<8x256xf32>
    %c0_1 = arith.constant 0 : index
    %c0_2 = arith.constant 0 : index
    %7 = vector.load %arg3[%c0_1, %c0_2] : memref<8x8xf32, #tpu.memory_space<vmem>>, vector<8x8xf32>
    %c0_3 = arith.constant 0 : index
    %c0_4 = arith.constant 0 : index
    %8 = vector.load %arg2[%c0_3, %c0_4] : memref<8x256xf32, #tpu.memory_space<vmem>>, vector<8x256xf32>
    %cst = arith.constant dense<0.000000e+00> : vector<8x8xf32>
    %9 = tpu.matmul %6, %8, %cst {dimension_numbers = #tpu.dot_dimension_numbers<[1], [1], [0], [0], [0, 0, 1, 0], [], []>} : vector<8x256xf32>, vector<8x256xf32>, vector<8x8xf32> -> vector<8x8xf32>
    %10 = arith.addf %7, %9 : vector<8x8xf32>
    %c0_5 = arith.constant 0 : index
    %c0_6 = arith.constant 0 : index
    %11 = vector.load %arg3[%c0_5, %c0_6] : memref<8x8xf32, #tpu.memory_space<vmem>>, vector<8x8xf32>
    tpu.vector_store %arg3[%c0_5, %c0_6], %10 {strides = array<i32>} : memref<8x8xf32, #tpu.memory_space<vmem>>, vector<8x8xf32>,
    %c0_i32_7 = arith.constant 0 : i32
    %12 = arith.cmpi eq, %arg1, %c0_i32_7 : i32
    %13 = arith.extui %12 : i1 to i32
    %c0_i32_8 = arith.constant 0 : i32
    %14 = arith.cmpi ne, %13, %c0_i32_8 : i32
    scf.if %14 {
      %c0_9 = arith.constant 0 : index
      %c0_10 = arith.constant 0 : index
      %15 = vector.load %arg3[%c0_9, %c0_10] : memref<8x8xf32, #tpu.memory_space<vmem>>, vector<8x8xf32>
      %cst_11 = arith.constant 4.8828125E-4 : f32
      %16 = vector.broadcast %cst_11 : f32 to vector<8x8xf32>
      %17 = arith.mulf %15, %16 : vector<8x8xf32>
      %c0_12 = arith.constant 0 : index
      %c0_13 = arith.constant 0 : index
      %18 = vector.load %arg3[%c0_12, %c0_13] : memref<8x8xf32, #tpu.memory_space<vmem>>, vector<8x8xf32>
      tpu.vector_store %arg3[%c0_12, %c0_13], %17 {strides = array<i32>} : memref<8x8xf32, #tpu.memory_space<vmem>>, vector<8x8xf32>,
    } else {
    }
    return
  }
  func.func @transform_0(%arg0: i32, %arg1: i32) -> (i32, i32) {
    %c0_i32 = arith.constant 0 : i32
    %c0_i32_0 = arith.constant 0 : i32
    return %c0_i32, %arg1 : i32, i32
  }
  func.func @transform_1(%arg0: i32, %arg1: i32) -> (i32, i32) {
    %c0_i32 = arith.constant 0 : i32
    %c0_i32_0 = arith.constant 0 : i32
    return %arg0, %c0_i32 : i32, i32
  }
}

</mosaic_0001>

<bundles_post_ra>
// kernel: tpu_custom_call.1
= control target key start
LH: loop header
LB: loop body
LE: loop exit
PB: predicated region body
PF: predicated region fallthrough
CT: control target
= control target key end

     0   :  { %6 = vsyncpa [#allocation3], 0  ;;  %s185_s0 = inlined_call_operand.hbm [shape: f32[8,256], index: 0, kind: input, shape index: {}]   ;;  %s186_s1 = inlined_call_operand.hbm [shape: f32[8,8], index: 1, kind: output, shape index: {}]  }
   0x1   :  { %7 = vsyncpa [#allocation4], 0  ;;  %s13_s8 = sshll.u32 %s185_s0, 4  ;;  %s163_s9 = smov [#allocation2]   ;;  %s14_s8 = int_to_ptr.hbm [resolvable:$true] %s13_s8 }
   0x2   :  { %s15_s10 = sshll.u32 %s163_s9, 4  ;;  %s16_s10 = int_to_ptr.vmem [resolvable:$true] %s15_s10 }
   0x3   :  { %18 = dma.hbm_to_vmem [thread:$0]  %s14_s8, 256, %s16_s10, [#allocation3]  }
   0x4   :  { %159 = dma.done.wait [#allocation3], 256  }
   0x5   :  { %160 = vsyncadd [#allocation3], 4294967040  ;;  %v38_v0 = vld [vmem:[#allocation2] sm:$0xff]  ;;  %v39_v1 = vld [vmem:[#allocation2 + $0x8] sm:$0xff]  ;;  %vm27_vm0 = vcmask 64512   ;;  %v164_v2 = vmov 0.0  }
   0x6   :  { %55 = vmatpush.xpose.msra.mxu0 %v38_v0  ;;  %75 = vmatpush.xpose.msra.mxu1 %v39_v1  ;;  %28 = vst.msk [vmem:[#allocation5] sm:$0xff] %vm27_vm0, %v164_v2  ;;  %s165_s0 = smov [#allocation5]   ;;  %s96_s14 = sshll.u32 %s186_s1, 4  ;;  %s97_s14 = int_to_ptr.hbm [resolvable:$true] %s96_s14 }
   0x7   :  { %s94_s11 = sshll.u32 %s165_s0, 4  ;;  %s95_s11 = int_to_ptr.vmem [resolvable:$true] %s94_s11 }
   0x9   :  { %56 = vmatmul.f32.vlgmr.msra.gmra.mxu0 %v38_v0  ;;  %76 = vmatmul.f32.vlgmr.msra.gmra.mxu1 %v39_v1 }
   0xd   :  { %v37_v4 = vld [vmem:[#allocation5] sm:$0xff] }
  0x86   :  { %v57_v3 = vpop.f32.mrf.mxu0  ;;  %v77_v5 = vpop.f32.mrf.mxu1 }
  0x87   :  { %v78_v6 = vadd.f32 %v77_v5, %v57_v3 }
  0x89   :  { %v80_v7 = vadd.f32 %v78_v6, %v37_v4 }
  0x8b   :  { %82 = vst.msk [vmem:[#allocation5] sm:$0xff] %vm27_vm0, %v80_v7 }
  0x92   :  { %v86_v8 = vld [vmem:[#allocation5] sm:$0xff] }
  0x93   :  { %v87_v9 = vmul.f32 0.00048828125, %v86_v8 }
  0x95   :  { %88 = vst.msk [vmem:[#allocation5] sm:$0xff] %vm27_vm0, %v87_v9 }
  0x96   :  { %99 = dma.vmem_to_hbm [thread:$0]  %s95_s11, 128, %s97_s14, [#allocation4]  }
  0x97   :  { %161 = dma.done.wait [#allocation4], 128  }
  0x98   :  { %162 = vsyncadd [#allocation4], 4294967168 }
  0x99   :  { %104 = vsyncpa [#allocation3], 1 }
  0x9a   :  { %105 = vsyncpa [#allocation4], 1 }

</bundles_post_ra>
